<compile_context>
chip_gen: v7x
topology: tpu7x:2x2x1
jax: 0.10.0
libtpu: 0.0.40
codegen_flags: <defaults>
</compile_context>

<pallas_src>
import functools

import jax
import jax.numpy as jnp
from jax.experimental import pallas as pl
from jax.experimental.pallas import tpu as pltpu

NUM_CLASSES = 1000  # pretrainedmodels.inceptionv4(pretrained='imagenet')
COUT_PAD = 128      # stem Cout 32 padded to a full lane width
TILE_S = 256        # spatial rows (oh*ow) per grid step


def _round_up(x, m):
    return (x + m - 1) // m * m


# ----------------------------------------------------------------------------
# Fused kernel: (im2col-GEMM conv + bias + ReLU) -> masked GAP accumulate ->
#               FC head on the last spatial step.
# Grid: (B, S_tiles);  batch is "parallel", spatial tiles are the reduction.
# ----------------------------------------------------------------------------
def _conv_gap_fc_kernel(p_ref, w_ref, b_ref, wfc_ref, bfc_ref, o_ref, acc_ref,
                        *, S, tile_s):
    ss = pl.program_id(1)

    @pl.when(ss == 0)
    def _():
        acc_ref[...] = jnp.zeros_like(acc_ref)

    # conv as GEMM on the MXU: [tile_s, K_pad] x [K_pad, COUT_PAD]
    acts = jnp.dot(p_ref[0], w_ref[...], preferred_element_type=jnp.float32)
    acts = jnp.maximum(acts + b_ref[...], 0.0)          # bias + ReLU

    # mask spatial padding rows (they would otherwise contribute relu(bias))
    rows = ss * tile_s + jax.lax.broadcasted_iota(jnp.int32, acts.shape, 0)
    acts = jnp.where(rows < S, acts, 0.0)

    # global-average-pool partial sum -> VMEM accumulator [1, COUT_PAD]
    acc_ref[...] += jnp.sum(acts, axis=0, keepdims=True)

    @pl.when(ss == pl.num_programs(1) - 1)
    def _():
        pooled = acc_ref[...] * (1.0 / S)                # mean over real positions
        logits = jnp.dot(pooled, wfc_ref[...],
                         preferred_element_type=jnp.float32) + bfc_ref[...]
        o_ref[0] = logits                                # [1, NC_PAD] lane-dense


# ----------------------------------------------------------------------------
# im2col glue (XLA): [B, C, H, W] -> [B, oh*ow, C*kh*kw]
# ----------------------------------------------------------------------------
def _im2col(x, kh, kw, stride):
    B, C, H, W = x.shape
    oh = (H - kh) // stride + 1
    ow = (W - kw) // stride + 1
    slabs = []
    for i in range(kh):
        for j in range(kw):
            slabs.append(x[:, :, i:i + stride * oh:stride, j:j + stride * ow:stride])
    p = jnp.stack(slabs, axis=2)                          # [B, C, kh*kw, oh, ow]
    p = p.transpose(0, 3, 4, 1, 2).reshape(B, oh * ow, C * kh * kw)
    return p, oh, ow


def stem_gap_fc(x, w, b, w_fc, b_fc, *, stride=2, tile_s=TILE_S):
    B, C, H, W = x.shape
    Cout, Cin, kh, kw = w.shape

    patches, oh, ow = _im2col(x, kh, kw, stride)          # [B, S, K]
    S = oh * ow
    K = Cin * kh * kw
    K_pad = _round_up(K, 8)                               # 27 -> 32
    NC_PAD = _round_up(NUM_CLASSES, 128)                  # 1000 -> 1024
    S_pad = _round_up(S, tile_s)
    num_s = S_pad // tile_s

    # zero-pad everything to lane/sublane-friendly shapes (exact: pads contribute 0)
    patches = jnp.pad(patches, ((0, 0), (0, S_pad - S), (0, K_pad - K)))
    w2 = jnp.pad(w.reshape(Cout, K).T,
                 ((0, K_pad - K), (0, COUT_PAD - Cout)))              # [K_pad, 128]
    b2 = jnp.pad(b, (0, COUT_PAD - Cout)).reshape(1, COUT_PAD)
    wfc = jnp.pad(w_fc, ((0, COUT_PAD - Cout), (0, NC_PAD - NUM_CLASSES)))
    bfc = jnp.pad(b_fc, (0, NC_PAD - NUM_CLASSES)).reshape(1, NC_PAD)

    kernel = functools.partial(_conv_gap_fc_kernel, S=S, tile_s=tile_s)

    out = pl.pallas_call(
        kernel,
        out_shape=jax.ShapeDtypeStruct((B, 1, NC_PAD), jnp.float32),
        grid=(B, num_s),
        in_specs=[
            pl.BlockSpec((1, tile_s, K_pad), lambda bb, ss: (bb, ss, 0)),   # patches
            pl.BlockSpec((K_pad, COUT_PAD), lambda bb, ss: (0, 0)),         # conv w
            pl.BlockSpec((1, COUT_PAD), lambda bb, ss: (0, 0)),             # conv b
            pl.BlockSpec((COUT_PAD, NC_PAD), lambda bb, ss: (0, 0)),        # fc w
            pl.BlockSpec((1, NC_PAD), lambda bb, ss: (0, 0)),               # fc b
        ],
        out_specs=pl.BlockSpec((1, 1, NC_PAD), lambda bb, ss: (bb, 0, 0)),
        scratch_shapes=[pltpu.VMEM((1, COUT_PAD), jnp.float32)],
        compiler_params=pltpu.CompilerParams(
            dimension_semantics=("parallel", "arbitrary")),
    )(patches, w2, b2, wfc, bfc)

    return out.reshape(B, NC_PAD)[:, :NUM_CLASSES]


# ----------------------------------------------------------------------------
# Full forward (mirrors Model.forward)
# ----------------------------------------------------------------------------
def model_forward(x, params):
    mean = jnp.array([0.485, 0.456, 0.406], dtype=jnp.float32)
    std = jnp.array([0.229, 0.224, 0.225], dtype=jnp.float32)
    inv_std = 1.0 / std

    # Fold the per-channel normalization into the stem conv (exact, affine):
    #   conv((x - mean)/std) == conv'(x)  with  w' = w/std[c],
    #   b' = b - Σ_{c,kh,kw} w[:,c,kh,kw] * mean[c]/std[c]
    w = params["conv_w"]                                   # [Cout, 3, 3, 3]
    b = params["conv_b"]
    w_fold = w * inv_std[None, :, None, None]
    b_fold = b - jnp.sum(w * (mean * inv_std)[None, :, None, None], axis=(1, 2, 3))

    return stem_gap_fc(x, w_fold, b_fold, params["fc_w"], params["fc_b"], stride=2)


def init_params(key):
    k1, k2, k3, k4 = jax.random.split(key, 4)
    cout = 32  # InceptionV4 stem: Conv2d(3, 32, kernel_size=3, stride=2)
    return {
        "conv_w": 0.05 * jax.random.normal(k1, (cout, 3, 3, 3), dtype=jnp.float32),
        "conv_b": 0.01 * jax.random.normal(k2, (cout,), dtype=jnp.float32),
        "fc_w": 0.05 * jax.random.normal(k3, (cout, NUM_CLASSES), dtype=jnp.float32),
        "fc_b": 0.01 * jax.random.normal(k4, (NUM_CLASSES,), dtype=jnp.float32),
    }


if __name__ == "__main__":
    key = jax.random.PRNGKey(0)
    kx, kp = jax.random.split(key)
    # Small stand-in for a 3x299x299 ImageNet image batch.
    x = jax.random.uniform(kx, (2, 3, 32, 32), dtype=jnp.float32)
    params = init_params(kp)

    logits = jax.jit(model_forward)(x, params)
    logits = jax.block_until_ready(logits)

    assert logits.shape == (2, NUM_CLASSES)
    assert logits.dtype == jnp.float32
    assert bool(jnp.all(jnp.isfinite(logits)))
    print("KERNEL_OK")
</pallas_src>

<mosaic_0001>
module attributes {stable_mosaic.version = 11 : i64} {
  func.func @_conv_gap_fc_kernel(%arg0: i32, %arg1: i32, %arg2: memref<1x256x32xf32, #tpu.memory_space<vmem>>, %arg3: memref<32x128xf32, #tpu.memory_space<vmem>>, %arg4: memref<1x128xf32, #tpu.memory_space<vmem>>, %arg5: memref<128x1024xf32, #tpu.memory_space<vmem>>, %arg6: memref<1x1024xf32, #tpu.memory_space<vmem>>, %arg7: memref<1x1x1024xf32, #tpu.memory_space<vmem>>, %arg8: memref<1x128xf32, #tpu.memory_space<vmem>>) attributes {dimension_semantics = [#tpu.dimension_semantics<parallel>, #tpu.dimension_semantics<arbitrary>], iteration_bounds = array<i64: 2, 1>, scalar_prefetch = 0 : i64, scratch_operands = 1 : i64, tpu.core_type = #tpu.core_type<tc>, window_params = [{transform_indices = @transform_0, window_bounds = array<i64: 1, 256, 32>}, {pipeline_mode = #tpu.pipeline_mode<synchronous>, transform_indices = @transform_1, window_bounds = array<i64: 32, 128>}, {pipeline_mode = #tpu.pipeline_mode<synchronous>, transform_indices = @transform_2, window_bounds = array<i64: 1, 128>}, {pipeline_mode = #tpu.pipeline_mode<synchronous>, transform_indices = @transform_3, window_bounds = array<i64: 128, 1024>}, {pipeline_mode = #tpu.pipeline_mode<synchronous>, transform_indices = @transform_4, window_bounds = array<i64: 1, 1024>}, {transform_indices = @transform_5, window_bounds = array<i64: 1, 1, 1024>}]} {
    %c0_i32 = arith.constant 0 : i32
    %0 = arith.cmpi eq, %arg1, %c0_i32 : i32
    %1 = arith.extui %0 : i1 to i32
    %c0_i32_0 = arith.constant 0 : i32
    %2 = arith.cmpi ne, %1, %c0_i32_0 : i32
    scf.if %2 {
      %cst_16 = arith.constant 0.000000e+00 : f32
      %28 = vector.broadcast %cst_16 : f32 to vector<1x128xf32>
      %c0_17 = arith.constant 0 : index
      %c0_18 = arith.constant 0 : index
      %29 = vector.load %arg8[%c0_17, %c0_18] : memref<1x128xf32, #tpu.memory_space<vmem>>, vector<1x128xf32>
      tpu.vector_store %arg8[%c0_17, %c0_18], %28 {strides = array<i32>} : memref<1x128xf32, #tpu.memory_space<vmem>>, vector<1x128xf32>,
    } else {
    }
    %c0 = arith.constant 0 : index
    %c0_1 = arith.constant 0 : index
    %c0_2 = arith.constant 0 : index
    %3 = vector.load %arg2[%c0, %c0_1, %c0_2] : memref<1x256x32xf32, #tpu.memory_space<vmem>>, vector<1x256x32xf32>
    %4 = vector.shape_cast %3 : vector<1x256x32xf32> to vector<256x32xf32>
    %c0_3 = arith.constant 0 : index
    %c0_4 = arith.constant 0 : index
    %5 = vector.load %arg3[%c0_3, %c0_4] : memref<32x128xf32, #tpu.memory_space<vmem>>, vector<32x128xf32>
    %cst = arith.constant dense<0.000000e+00> : vector<256x128xf32>
    %6 = tpu.matmul %4, %5, %cst {dimension_numbers = #tpu.dot_dimension_numbers<[1], [0], [0], [1], [0, 0, 1, 1], [], []>} : vector<256x32xf32>, vector<32x128xf32>, vector<256x128xf32> -> vector<256x128xf32>
    %c0_5 = arith.constant 0 : index
    %c0_6 = arith.constant 0 : index
    %7 = vector.load %arg4[%c0_5, %c0_6] : memref<1x128xf32, #tpu.memory_space<vmem>>, vector<1x128xf32>
    %8 = vector.broadcast %7 : vector<1x128xf32> to vector<256x128xf32>
    %9 = arith.addf %6, %8 : vector<256x128xf32>
    %cst_7 = arith.constant 0.000000e+00 : f32
    %10 = vector.broadcast %cst_7 : f32 to vector<256x128xf32>
    %11 = arith.maximumf %9, %10 : vector<256x128xf32>
    %c256_i32 = arith.constant 256 : i32
    %12 = arith.muli %arg1, %c256_i32 : i32
    %13 = tpu.iota {dimensions = array<i32: 0>} : vector<256x128xi32>
    %14 = vector.broadcast %12 : i32 to vector<256x128xi32>
    %15 = arith.addi %14, %13 : vector<256x128xi32>
    %c225_i32 = arith.constant 225 : i32
    %16 = vector.broadcast %c225_i32 : i32 to vector<256x128xi32>
    %17 = arith.cmpi slt, %15, %16 : vector<256x128xi32>
    %cst_8 = arith.constant 0.000000e+00 : f32
    %18 = vector.broadcast %cst_8 : f32 to vector<256x128xf32>
    %19 = arith.select %17, %11, %18 : vector<256x128xi1>, vector<256x128xf32>
    %c0_9 = arith.constant 0 : index
    %c0_10 = arith.constant 0 : index
    %20 = vector.load %arg8[%c0_9, %c0_10] : memref<1x128xf32, #tpu.memory_space<vmem>>, vector<1x128xf32>
    %cst_11 = arith.constant dense<0.000000e+00> : vector<128xf32>
    %21 = vector.multi_reduction <add>, %19, %cst_11 [0] : vector<256x128xf32> to vector<128xf32>
    %22 = vector.shape_cast %21 : vector<128xf32> to vector<1x128xf32>
    %23 = arith.addf %20, %22 : vector<1x128xf32>
    %c0_12 = arith.constant 0 : index
    %c0_13 = arith.constant 0 : index
    %24 = vector.load %arg8[%c0_12, %c0_13] : memref<1x128xf32, #tpu.memory_space<vmem>>, vector<1x128xf32>
    tpu.vector_store %arg8[%c0_12, %c0_13], %23 {strides = array<i32>} : memref<1x128xf32, #tpu.memory_space<vmem>>, vector<1x128xf32>,
    %c0_i32_14 = arith.constant 0 : i32
    %25 = arith.cmpi eq, %arg1, %c0_i32_14 : i32
    %26 = arith.extui %25 : i1 to i32
    %c0_i32_15 = arith.constant 0 : i32
    %27 = arith.cmpi ne, %26, %c0_i32_15 : i32
    scf.if %27 {
      %c0_16 = arith.constant 0 : index
      %c0_17 = arith.constant 0 : index
      %28 = vector.load %arg8[%c0_16, %c0_17] : memref<1x128xf32, #tpu.memory_space<vmem>>, vector<1x128xf32>
      %cst_18 = arith.constant 0.00444444455 : f32
      %29 = vector.broadcast %cst_18 : f32 to vector<1x128xf32>
      %30 = arith.mulf %28, %29 : vector<1x128xf32>
      %c0_19 = arith.constant 0 : index
      %c0_20 = arith.constant 0 : index
      %31 = vector.load %arg5[%c0_19, %c0_20] : memref<128x1024xf32, #tpu.memory_space<vmem>>, vector<128x1024xf32>
      %cst_21 = arith.constant dense<0.000000e+00> : vector<1x1024xf32>
      %32 = tpu.matmul %30, %31, %cst_21 {dimension_numbers = #tpu.dot_dimension_numbers<[1], [0], [0], [1], [0, 0, 1, 1], [], []>} : vector<1x128xf32>, vector<128x1024xf32>, vector<1x1024xf32> -> vector<1x1024xf32>
      %c0_22 = arith.constant 0 : index
      %c0_23 = arith.constant 0 : index
      %33 = vector.load %arg6[%c0_22, %c0_23] : memref<1x1024xf32, #tpu.memory_space<vmem>>, vector<1x1024xf32>
      %34 = arith.addf %32, %33 : vector<1x1024xf32>
      %c0_24 = arith.constant 0 : index
      %c0_25 = arith.constant 0 : index
      %c0_26 = arith.constant 0 : index
      %35 = vector.load %arg7[%c0_24, %c0_25, %c0_26] : memref<1x1x1024xf32, #tpu.memory_space<vmem>>, vector<1x1x1024xf32>
      %36 = vector.shape_cast %35 : vector<1x1x1024xf32> to vector<1x1024xf32>
      %37 = vector.shape_cast %34 : vector<1x1024xf32> to vector<1x1x1024xf32>
      tpu.vector_store %arg7[%c0_24, %c0_25, %c0_26], %37 {strides = array<i32>} : memref<1x1x1024xf32, #tpu.memory_space<vmem>>, vector<1x1x1024xf32>,
    } else {
    }
    return
  }
  func.func @transform_0(%arg0: i32, %arg1: i32) -> (i32, i32, i32) {
    %c0_i32 = arith.constant 0 : i32
    %c0_i32_0 = arith.constant 0 : i32
    return %arg0, %arg1, %c0_i32 : i32, i32, i32
  }
  func.func @transform_1(%arg0: i32, %arg1: i32) -> (i32, i32) {
    %c0_i32 = arith.constant 0 : i32
    %c0_i32_0 = arith.constant 0 : i32
    %c0_i32_1 = arith.constant 0 : i32
    return %c0_i32, %c0_i32_0 : i32, i32
  }
  func.func @transform_2(%arg0: i32, %arg1: i32) -> (i32, i32) {
    %c0_i32 = arith.constant 0 : i32
    %c0_i32_0 = arith.constant 0 : i32
    %c0_i32_1 = arith.constant 0 : i32
    return %c0_i32, %c0_i32_0 : i32, i32
  }
  func.func @transform_3(%arg0: i32, %arg1: i32) -> (i32, i32) {
    %c0_i32 = arith.constant 0 : i32
    %c0_i32_0 = arith.constant 0 : i32
    %c0_i32_1 = arith.constant 0 : i32
    return %c0_i32, %c0_i32_0 : i32, i32
  }
  func.func @transform_4(%arg0: i32, %arg1: i32) -> (i32, i32) {
    %c0_i32 = arith.constant 0 : i32
    %c0_i32_0 = arith.constant 0 : i32
    %c0_i32_1 = arith.constant 0 : i32
    return %c0_i32, %c0_i32_0 : i32, i32
  }
  func.func @transform_5(%arg0: i32, %arg1: i32) -> (i32, i32, i32) {
    %c0_i32 = arith.constant 0 : i32
    %c0_i32_0 = arith.constant 0 : i32
    %c0_i32_1 = arith.constant 0 : i32
    return %arg0, %c0_i32, %c0_i32_0 : i32, i32, i32
  }
}

</mosaic_0001>

<bundles_post_ra>
// kernel: sub.1
= control target key start
LH: loop header
LB: loop body
LE: loop exit
PB: predicated region body
PF: predicated region fallthrough
CT: control target
= control target key end

     0   :  { %s34_s0 = inlined_call_operand.vmem [shape: f32[32], index: 0, kind: input, shape index: {}]   ;;  %s35_s1 = inlined_call_operand.vmem [shape: f32[32], index: 1, kind: input, shape index: {}]   ;;  %s36_s2 = inlined_call_operand.vmem [shape: f32[32], index: 2, kind: output, shape index: {}]  }
   0x1   :  { %v3_v0 = vld [vmem:[%s34_s0] sm:$0x1] }
   0x2   :  { %v4_v1 = vld [vmem:[%s35_s1] sm:$0x1] }
   0x3   :  { %v7_v2 = vsub.f32 %v3_v0, %v4_v1 }
   0x5   :  { %9 = vst [vmem:[%s36_s2] sm:$0x1] %v7_v2 }

// kernel: model_forward.1
= control target key start
LH: loop header
LB: loop body
LE: loop exit
PB: predicated region body
PF: predicated region fallthrough
CT: control target
= control target key end

     0   :  { %s1763_s18 = smov 0   ;;  %s1765_s19 = smov 0   ;;  %s2322_s0 = inlined_call_operand.vmem [shape: f32[2,256,32], index: 0, kind: input, shape index: {}]   ;;  %s2323_s1 = inlined_call_operand.vmem [shape: f32[32,128], index: 1, kind: input, shape index: {}]   ;;  %s2324_s2 = inlined_call_operand.vmem [shape: f32[1,128], index: 2, kind: input, shape index: {}]   ;;  %s2325_s3 = inlined_call_operand.vmem [shape: f32[128,1024], index: 3, kind: input, shape index: {}]   ;;  %s2326_s4 = inlined_call_operand.vmem [shape: f32[1,1024], index: 4, kind: input, shape index: {}]   ;;  %s2327_s5 = inlined_call_operand.vmem [shape: f32[2,1,1024], index: 5, kind: output, shape index: {}]  }
   0x1   :  { %s1767_s20 = smov 0  }
   0x2 LB: > { %s27_s21 = sadd.s32 1, %s1725_s19  ;;  %p1413_p0 = scmp.ge.s32.totalorder %s1729_s20, 1  ;;  %s1729_s20 = sphi %s1767_s20, %s15_s20   ;;  %s1725_s19 = sphi %s1765_s19, %s2329_s19   ;;  %s1721_s18 = sphi %s1763_s18, %s2328_s18  }
   0x3   : > { %p29_p1 = scmp.ge.s32.totalorder %s27_s21, 2  ;;  %p206_p2 = scmp.lt.s32.totalorder %s1729_s20, 3 }
   0x5   : > { %s2331_s21 = smov (%p29_p1, %s27_s21), 0  ;;  %p207_p3 = pnand %p1413_p0, %p206_p2 }
   0x6   : > { %v288_v0 = vld [vmem:[%s2323_s1] sm:$0xff] (!%p207_p3)  ;;  %v289_v1 = vld [vmem:[%s2323_s1 + $0x8] sm:$0xff] (!%p207_p3)  ;;  %v290_v2 = vld [vmem:[%s2323_s1 + $0x10] sm:$0xff] (!%p207_p3)  ;;  %p238_p4 = scmp.lt.s32.totalorder (!%p207_p3), %s1721_s18, 1  ;;  %vm299_vm0 = vcmask (!%p207_p3), 261120  }
   0x7   : > { %210 = sbr.rel (%p207_p3) target bundleno = 609 (0x261), region = 40  ;;  %v1545_v3 = vpack.c.bf16 (!%p207_p3), %v289_v1, %v288_v0  ;;  %v291_v4 = vld [vmem:[%s2323_s1 + $0x18] sm:$0xff] (!%p207_p3)  ;;  %v830_v36 = vld [vmem:[%s2325_s3 + $0x8] sm:$0xff] (!%p207_p3)  ;;  %v829_v39 = vld [vmem:[%s2325_s3] sm:$0xff] (!%p207_p3) }
   0x8   : > { %v1549_v5 = vpack.c.bf16 (!%p207_p3), %v291_v4, %v290_v2  ;;  %v838_v37 = vld [vmem:[%s2325_s3 + $0x48] sm:$0xff] (!%p207_p3)  ;;  %v837_v40 = vld [vmem:[%s2325_s3 + $0x40] sm:$0xff] (!%p207_p3) }
   0x9   : > { %1546 = vmatprep.subr.bf16.mxu0 (!%p207_p3), %v1545_v3  ;;  %v1553_v38 = vpack.c.bf16 (!%p207_p3), %v838_v37, %v830_v36  ;;  %v834_v41 = vld [vmem:[%s2325_s3 + $0x28] sm:$0xff] (!%p207_p3)  ;;  %v1555_v42 = vpack.c.bf16 (!%p207_p3), %v837_v40, %v829_v39  ;;  %v833_v44 = vld [vmem:[%s2325_s3 + $0x20] sm:$0xff] (!%p207_p3) }
   0xa   : > { %1548 = vmatpush3.bf16.msra.mxu0 (!%p207_p3), %v1545_v3  ;;  %v842_v43 = vld [vmem:[%s2325_s3 + $0x68] sm:$0xff] (!%p207_p3)  ;;  %v841_v45 = vld [vmem:[%s2325_s3 + $0x60] sm:$0xff] (!%p207_p3) }
   0xb   : > { %1550 = vmatprep.subr.bf16.mxu0 (!%p207_p3), %v1549_v5  ;;  %1554 = vmatprep.subr.bf16.mxu1 (!%p207_p3), %v1553_v38  ;;  %v1617_v46 = vpack.c.bf16 (!%p207_p3), %v842_v43, %v834_v41  ;;  %v1619_v47 = vpack.c.bf16 (!%p207_p3), %v841_v45, %v833_v44  ;;  %v846_v48 = vld [vmem:[%s2325_s3 + $0x88] sm:$0xff] (!%p207_p3)  ;;  %v845_v51 = vld [vmem:[%s2325_s3 + $0x80] sm:$0xff] (!%p207_p3) }
   0xc   : > { %1556 = vmatpush1.bf16.msra.mxu1 (!%p207_p3), %v1555_v42  ;;  %v854_v49 = vld [vmem:[%s2325_s3 + $0xc8] sm:$0xff] (!%p207_p3)  ;;  %v853_v52 = vld [vmem:[%s2325_s3 + $0xc0] sm:$0xff] (!%p207_p3) }
   0xd   : > { %v1557_v50 = vpack.c.bf16 (!%p207_p3), %v854_v49, %v846_v48  ;;  %v850_v53 = vld [vmem:[%s2325_s3 + $0xa8] sm:$0xff] (!%p207_p3)  ;;  %v1559_v54 = vpack.c.bf16 (!%p207_p3), %v853_v52, %v845_v51  ;;  %v849_v56 = vld [vmem:[%s2325_s3 + $0xa0] sm:$0xff] (!%p207_p3) }
   0xe   : > { %s2333_s18 = smov (!%p238_p4, %s1721_s18), 1  ;;  %1552 = vmatpush3.bf16.msra.mxu0 %v1549_v5  ;;  %v858_v55 = vld [vmem:[%s2325_s3 + $0xe8] sm:$0xff]  ;;  %v857_v57 = vld [vmem:[%s2325_s3 + $0xe0] sm:$0xff] }
   0xf   : > { %s1452_s30 = sshll.u32 %s2333_s18, 8  ;;  %1618 = vmatprep.subr.bf16.mxu0 %v1617_v46  ;;  %1558 = vmatprep.subr.bf16.mxu1 %v1557_v50  ;;  %v1621_v58 = vpack.c.bf16 %v858_v55, %v850_v53  ;;  %v1623_v59 = vpack.c.bf16 %v857_v57, %v849_v56  ;;  %v862_v60 = vld [vmem:[%s2325_s3 + $0x108] sm:$0xff]  ;;  %v861_v63 = vld [vmem:[%s2325_s3 + $0x100] sm:$0xff]  ;;  %s1416_s26 = sshll.u32 %s2333_s18, 3 }
  0x10   : > { %s1799_s8 = scalar_lea.vmem %s2322_s0, %s1452_s30  ;;  %1560 = vmatpush1.bf16.msra.mxu1 %v1559_v54  ;;  %v870_v61 = vld [vmem:[%s2325_s3 + $0x148] sm:$0xff]  ;;  %v869_v0 = vld [vmem:[%s2325_s3 + $0x140] sm:$0xff]  ;;  %s250_s29 = scalar_lea.vmem %s2327_s5, %s1416_s26 }
  0x11   : > { %v256_v6 = vld [vmem:[%s1799_s8] sm:$0xff]  ;;  %v257_v7 = vld [vmem:[%s1799_s8 + $0x8] sm:$0xff]  ;;  %v258_v8 = vld [vmem:[%s1799_s8 + $0x10] sm:$0xff]  ;;  %v1561_v62 = vpack.c.bf16 %v870_v61, %v862_v60  ;;  %v1563_v2 = vpack.c.bf16 %v869_v0, %v861_v63 }
  0x12   : > { %1497 = vmatprep.mubr.msk.f32.mxu0 %vm299_vm0, %v256_v6  ;;  %v259_v9 = vld [vmem:[%s1799_s8 + $0x18] sm:$0xff]  ;;  %v260_v10 = vld [vmem:[%s1799_s8 + $0x20] sm:$0xff]  ;;  %v261_v11 = vld [vmem:[%s1799_s8 + $0x28] sm:$0xff] }
  0x13   : > { %1498 = vmatmul.mubr.msk.f32.vlgmr.msra.gmra.mrb[0].mxu0 %vm299_vm0, %v257_v7  ;;  %v262_v12 = vld [vmem:[%s1799_s8 + $0x30] sm:$0xff]  ;;  %v263_v13 = vld [vmem:[%s1799_s8 + $0x38] sm:$0xff]  ;;  %v264_v14 = vld [vmem:[%s1799_s8 + $0x40] sm:$0xff]  ;;  %1562 = vmatprep.subr.bf16.mxu1 %v1561_v62 }
  0x14   : > { %1500 = vmatprep.mubr.msk.f32.mxu0 %vm299_vm0, %v258_v8  ;;  %v265_v15 = vld [vmem:[%s1799_s8 + $0x48] sm:$0xff]  ;;  %v266_v16 = vld [vmem:[%s1799_s8 + $0x50] sm:$0xff]  ;;  %v267_v17 = vld [vmem:[%s1799_s8 + $0x58] sm:$0xff]  ;;  %1620 = vmatpush1.bf16.msra.mxu0 %v1619_v47 }
  0x15   : > { %v268_v18 = vld [vmem:[%s1799_s8 + $0x60] sm:$0xff]  ;;  %v269_v19 = vld [vmem:[%s1799_s8 + $0x68] sm:$0xff]  ;;  %v270_v20 = vld [vmem:[%s1799_s8 + $0x70] sm:$0xff]  ;;  %1622 = vmatprep.subr.bf16.mxu0 %v1621_v58  ;;  %1564 = vmatpush1.bf16.msra.mxu1 %v1563_v2 }
  0x16   : > { %v271_v21 = vld [vmem:[%s1799_s8 + $0x78] sm:$0xff]  ;;  %v272_v22 = vld [vmem:[%s1799_s8 + $0x80] sm:$0xff]  ;;  %v273_v23 = vld [vmem:[%s1799_s8 + $0x88] sm:$0xff] }
  0x17   : > { %1501 = vmatmul.mubr.msk.f32.gmra.mrb[2].mxu0 %vm299_vm0, %v259_v9  ;;  %v274_v24 = vld [vmem:[%s1799_s8 + $0x90] sm:$0xff]  ;;  %v275_v25 = vld [vmem:[%s1799_s8 + $0x98] sm:$0xff]  ;;  %v276_v26 = vld [vmem:[%s1799_s8 + $0xa0] sm:$0xff] }
  0x18   : > { %1503 = vmatprep.mubr.msk.f32.mxu0 %vm299_vm0, %v260_v10  ;;  %v277_v27 = vld [vmem:[%s1799_s8 + $0xa8] sm:$0xff]  ;;  %v278_v28 = vld [vmem:[%s1799_s8 + $0xb0] sm:$0xff]  ;;  %v279_v29 = vld [vmem:[%s1799_s8 + $0xb8] sm:$0xff]  ;;  %1624 = vmatpush1.bf16.msra.mxu0 %v1623_v59 }
  0x19   : > { %v280_v30 = vld [vmem:[%s1799_s8 + $0xc0] sm:$0xff]  ;;  %v281_v31 = vld [vmem:[%s1799_s8 + $0xc8] sm:$0xff]  ;;  %v282_v32 = vld [vmem:[%s1799_s8 + $0xd0] sm:$0xff] }
  0x1a   : > { %v283_v33 = vld [vmem:[%s1799_s8 + $0xd8] sm:$0xff]  ;;  %v284_v34 = vld [vmem:[%s1799_s8 + $0xe0] sm:$0xff]  ;;  %v285_v35 = vld [vmem:[%s1799_s8 + $0xe8] sm:$0xff] }
  0x1b   : > { %1504 = vmatmul.mubr.msk.f32.gmra.mrb[4].mxu0 %vm299_vm0, %v261_v11  ;;  %v866_v1 = vld [vmem:[%s2325_s3 + $0x128] sm:$0xff]  ;;  %v865_v4 = vld [vmem:[%s2325_s3 + $0x120] sm:$0xff]  ;;  %v286_v56 = vld [vmem:[%s1799_s8 + $0xf0] sm:$0xff] }
  0x1c   : > { %1506 = vmatprep.mubr.msk.f32.mxu0 %vm299_vm0, %v262_v12  ;;  %v874_v3 = vld [vmem:[%s2325_s3 + $0x168] sm:$0xff]  ;;  %v873_v5 = vld [vmem:[%s2325_s3 + $0x160] sm:$0xff]  ;;  %v287_v60 = vld [vmem:[%s1799_s8 + $0xf8] sm:$0xff] }
  0x1d   : > { %v1625_v6 = vpack.c.bf16 %v874_v3, %v866_v1  ;;  %v1627_v7 = vpack.c.bf16 %v873_v5, %v865_v4  ;;  %v878_v8 = vld [vmem:[%s2325_s3 + $0x188] sm:$0xff]  ;;  %v877_v11 = vld [vmem:[%s2325_s3 + $0x180] sm:$0xff] }
  0x1e   : > { %v886_v9 = vld [vmem:[%s2325_s3 + $0x1c8] sm:$0xff]  ;;  %v885_v12 = vld [vmem:[%s2325_s3 + $0x1c0] sm:$0xff] }
  0x1f   : > { %1507 = vmatmul.mubr.msk.f32.gmra.mrb[6].mxu0 %vm299_vm0, %v263_v13  ;;  %1626 = vmatprep.subr.bf16.mxu0 %v1625_v6  ;;  %v1565_v10 = vpack.c.bf16 %v886_v9, %v878_v8  ;;  %v882_v13 = vld [vmem:[%s2325_s3 + $0x1a8] sm:$0xff]  ;;  %v909_v36 = vld [vmem:[%s2325_s3 + $0x280] sm:$0xff]  ;;  %v832_v6 = vld [vmem:[%s2325_s3 + $0x18] sm:$0xff] }
  0x20   : > { %1509 = vmatprep.mubr.msk.f32.mxu0 %vm299_vm0, %v264_v14  ;;  %1628 = vmatpush1.bf16.msra.mxu0 %v1627_v7  ;;  %v1567_v14 = vpack.c.bf16 %v885_v12, %v877_v11  ;;  %v917_v37 = vld [vmem:[%s2325_s3 + $0x2c0] sm:$0xff]  ;;  %v914_v38 = vld [vmem:[%s2325_s3 + $0x2a8] sm:$0xff]  ;;  %v840_v7 = vld [vmem:[%s2325_s3 + $0x58] sm:$0xff] }
  0x21   : > { %1566 = vmatprep.subr.bf16.mxu1 %v1565_v10  ;;  %v1575_v39 = vpack.c.bf16 %v917_v37, %v909_v36  ;;  %v922_v40 = vld [vmem:[%s2325_s3 + $0x2e8] sm:$0xff]  ;;  %v913_v41 = vld [vmem:[%s2325_s3 + $0x2a0] sm:$0xff]  ;;  %v1585_v9 = vpack.c.bf16 %v840_v7, %v832_v6 }
  0x22   : > { %1568 = vmatpush1.bf16.msra.mxu1 %v1567_v14  ;;  %v921_v42 = vld [vmem:[%s2325_s3 + $0x2e0] sm:$0xff]  ;;  %v1637_v43 = vpack.c.bf16 %v922_v40, %v914_v38  ;;  %v926_v45 = vld [vmem:[%s2325_s3 + $0x308] sm:$0xff] }
  0x23   : > { %1510 = vmatmul.mubr.msk.f32.gmra.mrb[8].mxu0 %vm299_vm0, %v265_v15  ;;  %v890_v15 = vld [vmem:[%s2325_s3 + $0x1e8] sm:$0xff]  ;;  %v1639_v44 = vpack.c.bf16 %v921_v42, %v913_v41  ;;  %v925_v47 = vld [vmem:[%s2325_s3 + $0x300] sm:$0xff] }
  0x24   : > { %1512 = vmatprep.mubr.msk.f32.mxu0 %vm299_vm0, %v266_v16  ;;  %v881_v16 = vld [vmem:[%s2325_s3 + $0x1a0] sm:$0xff]  ;;  %v934_v46 = vld [vmem:[%s2325_s3 + $0x348] sm:$0xff] }
  0x25   : > { %v1577_v48 = vpack.c.bf16 %v934_v46, %v926_v45  ;;  %v933_v49 = vld [vmem:[%s2325_s3 + $0x340] sm:$0xff]  ;;  %v930_v50 = vld [vmem:[%s2325_s3 + $0x328] sm:$0xff] }
  0x26   : > { %v938_v51 = vld [vmem:[%s2325_s3 + $0x368] sm:$0xff]  ;;  %v1579_v52 = vpack.c.bf16 %v933_v49, %v925_v47  ;;  %v929_v54 = vld [vmem:[%s2325_s3 + $0x320] sm:$0xff] }
  0x27   : > { %1513 = vmatmul.mubr.msk.f32.gmra.mrb[10].mxu0 %vm299_vm0, %v267_v17  ;;  %v889_v17 = vld [vmem:[%s2325_s3 + $0x1e0] sm:$0xff]  ;;  %v1641_v53 = vpack.c.bf16 %v938_v51, %v930_v50  ;;  %v942_v58 = vld [vmem:[%s2325_s3 + $0x388] sm:$0xff] }
  0x28   : > { %1515 = vmatprep.mubr.msk.f32.mxu0 %vm299_vm0, %v268_v18  ;;  %v1629_v18 = vpack.c.bf16 %v890_v15, %v882_v13  ;;  %v937_v55 = vld [vmem:[%s2325_s3 + $0x360] sm:$0xff]  ;;  %v950_v59 = vld [vmem:[%s2325_s3 + $0x3c8] sm:$0xff] }
  0x29   : > { %v1643_v57 = vpack.c.bf16 %v937_v55, %v929_v54  ;;  %v1581_v61 = vpack.c.bf16 %v950_v59, %v942_v58  ;;  %v941_v62 = vld [vmem:[%s2325_s3 + $0x380] sm:$0xff]  ;;  %v946_v0 = vld [vmem:[%s2325_s3 + $0x3a8] sm:$0xff] }
  0x2a   : > { %1630 = vmatprep.subr.bf16.mxu0 %v1629_v18  ;;  %v949_v63 = vld [vmem:[%s2325_s3 + $0x3c0] sm:$0xff]  ;;  %v954_v2 = vld [vmem:[%s2325_s3 + $0x3e8] sm:$0xff] }
  0x2b   : > { %1516 = vmatmul.mubr.msk.f32.gmra.mrb[12].mxu0 %vm299_vm0, %v269_v19  ;;  %v1631_v19 = vpack.c.bf16 %v889_v17, %v881_v16  ;;  %v1583_v1 = vpack.c.bf16 %v949_v63, %v941_v62  ;;  %v945_v3 = vld [vmem:[%s2325_s3 + $0x3a0] sm:$0xff]  ;;  %v1645_v5 = vpack.c.bf16 %v954_v2, %v946_v0 }
  0x2c   : > { %1518 = vmatprep.mubr.msk.f32.mxu0 %vm299_vm0, %v270_v20  ;;  %v894_v20 = vld [vmem:[%s2325_s3 + $0x208] sm:$0xff]  ;;  %v953_v4 = vld [vmem:[%s2325_s3 + $0x3e0] sm:$0xff] }
  0x2d   : > { %1632 = vmatpush1.bf16.msra.mxu0 %v1631_v19  ;;  %v1647_v8 = vpack.c.bf16 %v953_v4, %v945_v3  ;;  %v2069_v10 = vld [vmem:[%s2324_s2] ss:$0 sm:$0xff] }
  0x2f   : > { %1519 = vmatmul.mubr.msk.f32.gmra.mrb[14].mxu0 %vm299_vm0, %v271_v21  ;;  %v902_v21 = vld [vmem:[%s2325_s3 + $0x248] sm:$0xff] }
  0x30   : > { %1521 = vmatprep.mubr.msk.f32.mxu0 %vm299_vm0, %v272_v22  ;;  %v1731_v22 = vmov 0.0  }
  0x31   : > { %255 = vst [vmem:[#allocation2] sm:$0x1] %v1731_v22  ;;  %1063 = vmatprep.mubr.f32.mxu1 %v1731_v22 }
  0x33   : > { %1522 = vmatmul.mubr.msk.f32.gmra.mrb[16].mxu0 %vm299_vm0, %v273_v23  ;;  %v1569_v23 = vpack.c.bf16 %v902_v21, %v894_v20 }
  0x34   : > { %1524 = vmatprep.mubr.msk.f32.mxu0 %vm299_vm0, %v274_v24  ;;  %v893_v24 = vld [vmem:[%s2325_s3 + $0x200] sm:$0xff] }
  0x35   : > { %1570 = vmatprep.subr.bf16.mxu1 %v1569_v23 }
  0x37   : > { %1525 = vmatmul.mubr.msk.f32.gmra.mrb[18].mxu0 %vm299_vm0, %v275_v25  ;;  %v901_v25 = vld [vmem:[%s2325_s3 + $0x240] sm:$0xff] }
  0x38   : > { %1527 = vmatprep.mubr.msk.f32.mxu0 %vm299_vm0, %v276_v26  ;;  %v898_v26 = vld [vmem:[%s2325_s3 + $0x228] sm:$0xff] }
  0x3b   : > { %1528 = vmatmul.mubr.msk.f32.gmra.mrb[20].mxu0 %vm299_vm0, %v277_v27  ;;  %v1571_v27 = vpack.c.bf16 %v901_v25, %v893_v24 }
  0x3c   : > { %1530 = vmatprep.mubr.msk.f32.mxu0 %vm299_vm0, %v278_v28  ;;  %v906_v28 = vld [vmem:[%s2325_s3 + $0x268] sm:$0xff] }
  0x3d   : > { %1572 = vmatpush1.bf16.msra.mxu1 %v1571_v27 }
  0x3f   : > { %1531 = vmatmul.mubr.msk.f32.gmra.mrb[22].mxu0 %vm299_vm0, %v279_v29  ;;  %v897_v29 = vld [vmem:[%s2325_s3 + $0x220] sm:$0xff] }
  0x40   : > { %1533 = vmatprep.mubr.msk.f32.mxu0 %vm299_vm0, %v280_v30  ;;  %v905_v30 = vld [vmem:[%s2325_s3 + $0x260] sm:$0xff] }
  0x43   : > { %1534 = vmatmul.mubr.msk.f32.gmra.mrb[24].mxu0 %vm299_vm0, %v281_v31  ;;  %v1633_v31 = vpack.c.bf16 %v906_v28, %v898_v26 }
  0x44   : > { %1536 = vmatprep.mubr.msk.f32.mxu0 %vm299_vm0, %v282_v32  ;;  %v1635_v32 = vpack.c.bf16 %v905_v30, %v897_v29 }
  0x45   : > { %1634 = vmatprep.subr.bf16.mxu0 %v1633_v31 }
  0x46   : > { %1636 = vmatpush1.bf16.msra.mxu0 %v1635_v32 }
  0x47   : > { %1537 = vmatmul.mubr.msk.f32.gmra.mrb[26].mxu0 %vm299_vm0, %v283_v33  ;;  %v910_v33 = vld [vmem:[%s2325_s3 + $0x288] sm:$0xff]  ;;  %1638 = vmatprep.subr.bf16.mxu0 %v1637_v43 }
  0x48   : > { %1539 = vmatprep.mubr.msk.f32.mxu0 %vm299_vm0, %v284_v34  ;;  %v918_v34 = vld [vmem:[%s2325_s3 + $0x2c8] sm:$0xff] }
  0x4a   : > { %1640 = vmatpush1.bf16.msra.mxu0 %v1639_v44 }
  0x4b   : > { %1540 = vmatmul.mubr.msk.f32.gmra.mrb[28].mxu0 %vm299_vm0, %v285_v35  ;;  %v1573_v35 = vpack.c.bf16 %v918_v34, %v910_v33  ;;  %1642 = vmatprep.subr.bf16.mxu0 %v1641_v53 }
  0x4c   : > { %1542 = vmatprep.mubr.msk.f32.mxu0 %vm299_vm0, %v286_v56 }
  0x4d   : > { %1574 = vmatprep.subr.bf16.mxu1 %v1573_v35 }
  0x4e   : > { %1576 = vmatpush1.bf16.msra.mxu1 %v1575_v39  ;;  %1644 = vmatpush1.bf16.msra.mxu0 %v1643_v57 }
  0x4f   : > { %1578 = vmatprep.subr.bf16.mxu1 %v1577_v48  ;;  %1543 = vmatmul.mubr.msk.f32.gmra.mrb[30].mxu0 %vm299_vm0, %v287_v60 }
  0x50   : > { %1205 = vmatprep.mubr.f32.mxu0 %v1731_v22  ;;  %1646 = vmatprep.subr.bf16.mxu0 %v1645_v5 }
  0x52   : > { %1580 = vmatpush1.bf16.msra.mxu1 %v1579_v52  ;;  %1648 = vmatpush1.bf16.msra.mxu0 %v1647_v8 }
  0x53   : > { %1582 = vmatprep.subr.bf16.mxu1 %v1581_v61 }
  0x56   : > { %1584 = vmatpush1.bf16.msra.mxu1 %v1583_v1 }
  0x57   : > { %1586 = vmatprep.subr.bf16.mxu1 %v1585_v9 }
  0xe6   : > { %v1499_v11 = vpop.f32.mrb[0].mxu0 }
  0xe7   : > { %v468_v12 = vadd.f32 %v1499_v11, %v2069_v10  ;;  %v462_v13 = vpop.f32.mrb[1].mxu0 }
  0xe8   : > { %v463_v14 = vadd.f32 %v2069_v10, %v462_v13 }
  0xe9   : > { %v622_v15 = vmax.f32 %v468_v12, 0.0 }
  0xea   : > { %v621_v16 = vmax.f32 %v463_v14, 0.0  ;;  %v1502_v17 = vpop.f32.mrb[2].mxu0 }
  0xeb   : > { %v472_v18 = vpop.f32.mrb[3].mxu0  ;;  %v478_v20 = vadd.f32 %v1502_v17, %v2069_v10 }
  0xec   : > { %v785_v19 = vadd.f32 %v622_v15, %v621_v16  ;;  %v473_v21 = vadd.f32 %v2069_v10, %v472_v18 }
  0xed   : > { %v624_v26 = vmax.f32 %v478_v20, 0.0 }
  0xee   : > { %v623_v23 = vmax.f32 %v473_v21, 0.0  ;;  %v1505_v24 = vpop.f32.mrb[4].mxu0 }
  0xef   : > { %v482_v25 = vpop.f32.mrb[5].mxu0  ;;  %v488_v28 = vadd.f32 %v1505_v24, %v2069_v10 }
  0xf0   : > { %v786_v27 = vadd.f32 %v785_v19, %v623_v23  ;;  %v483_v29 = vadd.f32 %v2069_v10, %v482_v25 }
  0xf1   : > { %v626_v34 = vmax.f32 %v488_v28, 0.0 }
  0xf2   : > { %v625_v30 = vmax.f32 %v483_v29, 0.0  ;;  %v787_v31 = vadd.f32 %v786_v27, %v624_v26  ;;  %v1508_v32 = vpop.f32.mrb[6].mxu0 }
  0xf3   : > { %v492_v33 = vpop.f32.mrb[7].mxu0  ;;  %v498_v36 = vadd.f32 %v1508_v32, %v2069_v10 }
  0xf4   : > { %v788_v35 = vadd.f32 %v787_v31, %v625_v30  ;;  %v493_v37 = vadd.f32 %v2069_v10, %v492_v33 }
  0xf5   : > { %v628_v42 = vmax.f32 %v498_v36, 0.0 }
  0xf6   : > { %v627_v38 = vmax.f32 %v493_v37, 0.0  ;;  %v789_v39 = vadd.f32 %v788_v35, %v626_v34  ;;  %v1511_v40 = vpop.f32.mrb[8].mxu0 }
  0xf7   : > { %v502_v41 = vpop.f32.mrb[9].mxu0  ;;  %v508_v44 = vadd.f32 %v1511_v40, %v2069_v10  ;;  %v654_v40 = vlaneseq }
  0xf8   : > { %v790_v43 = vadd.f32 %v789_v39, %v627_v38  ;;  %v503_v45 = vadd.f32 %v2069_v10, %v502_v41 }
  0xf9   : > { %v630_v50 = vmax.f32 %v508_v44, 0.0 }
  0xfa   : > { %v629_v46 = vmax.f32 %v503_v45, 0.0  ;;  %v791_v47 = vadd.f32 %v790_v43, %v628_v42  ;;  %v1514_v48 = vpop.f32.mrb[10].mxu0 }
  0xfb   : > { %v512_v49 = vpop.f32.mrb[11].mxu0  ;;  %v518_v52 = vadd.f32 %v1514_v48, %v2069_v10 }
  0xfc   : > { %v792_v51 = vadd.f32 %v791_v47, %v629_v46  ;;  %v513_v53 = vadd.f32 %v2069_v10, %v512_v49  ;;  %v2097_v49 = vshrl.u32 %v654_v40, 7 }
  0xfd   : > { %v632_v58 = vmax.f32 %v518_v52, 0.0 }
  0xfe   : > { %v631_v54 = vmax.f32 %v513_v53, 0.0  ;;  %v793_v55 = vadd.f32 %v792_v51, %v630_v50  ;;  %v1517_v56 = vpop.f32.mrb[12].mxu0 }
  0xff   : > { %v522_v57 = vpop.f32.mrb[13].mxu0  ;;  %v528_v60 = vadd.f32 %v1517_v56, %v2069_v10 }
 0x100   : > { %v794_v59 = vadd.f32 %v793_v55, %v631_v54  ;;  %v523_v61 = vadd.f32 %v2069_v10, %v522_v57 }
 0x101   : > { %v634_v2 = vmax.f32 %v528_v60, 0.0 }
 0x102   : > { %v633_v62 = vmax.f32 %v523_v61, 0.0  ;;  %v795_v63 = vadd.f32 %v794_v59, %v632_v58  ;;  %v1520_v0 = vpop.f32.mrb[14].mxu0  ;;  %v683_v58 = vadd.s32 224, %v2097_v49 }
 0x103   : > { %v532_v1 = vpop.f32.mrb[15].mxu0  ;;  %v538_v4 = vadd.f32 %v1520_v0, %v2069_v10 }
 0x104   : > { %v796_v3 = vadd.f32 %v795_v63, %v633_v62  ;;  %v533_v5 = vadd.f32 %v2069_v10, %v532_v1  ;;  %vm748_vm1 = vcmp.lt.s32.totalorder %v683_v58, 225 }
 0x105   : > { %v636_v11 = vmax.f32 %v538_v4, 0.0 }
 0x106   : > { %v635_v6 = vmax.f32 %v533_v5, 0.0  ;;  %v797_v7 = vadd.f32 %v796_v3, %v634_v2  ;;  %v1523_v8 = vpop.f32.mrb[16].mxu0 }
 0x107   : > { %v542_v9 = vpop.f32.mrb[17].mxu0  ;;  %v548_v13 = vadd.f32 %v1523_v8, %v2069_v10 }
 0x108   : > { %v798_v12 = vadd.f32 %v797_v7, %v635_v6  ;;  %v543_v14 = vadd.f32 %v2069_v10, %v542_v9 }
 0x109   : > { %v638_v19 = vmax.f32 %v548_v13, 0.0 }
 0x10a   : > { %v637_v15 = vmax.f32 %v543_v14, 0.0  ;;  %v799_v16 = vadd.f32 %v798_v12, %v636_v11  ;;  %v1526_v17 = vpop.f32.mrb[18].mxu0  ;;  %v784_v12 = vld [vmem:[#allocation2] sm:$0x1] }
 0x10b   : > { %v552_v18 = vpop.f32.mrb[19].mxu0  ;;  %v558_v21 = vadd.f32 %v1526_v17, %v2069_v10  ;;  %v856_v17 = vld [vmem:[%s2325_s3 + $0xd8] sm:$0xff] }
 0x10c   : > { %v800_v20 = vadd.f32 %v799_v16, %v637_v15  ;;  %v553_v23 = vadd.f32 %v2069_v10, %v552_v18  ;;  %v831_v15 = vld [vmem:[%s2325_s3 + $0x10] sm:$0xff]  ;;  %v848_v16 = vld [vmem:[%s2325_s3 + $0x98] sm:$0xff] }
 0x10d   : > { %v640_v28 = vmax.f32 %v558_v21, 0.0  ;;  %v1589_v21 = vpack.c.bf16 %v856_v17, %v848_v16  ;;  %v884_v16 = vld [vmem:[%s2325_s3 + $0x1b8] sm:$0xff] }
 0x10e   : > { %v639_v24 = vmax.f32 %v553_v23, 0.0  ;;  %v801_v25 = vadd.f32 %v800_v20, %v638_v19  ;;  %v1529_v26 = vpop.f32.mrb[20].mxu0  ;;  %v847_v23 = vld [vmem:[%s2325_s3 + $0x90] sm:$0xff]  ;;  %v892_v17 = vld [vmem:[%s2325_s3 + $0x1f8] sm:$0xff] }
 0x10f   : > { %v562_v27 = vpop.f32.mrb[21].mxu0  ;;  %v568_v30 = vadd.f32 %v1529_v26, %v2069_v10  ;;  %v872_v26 = vld [vmem:[%s2325_s3 + $0x158] sm:$0xff] }
 0x110   : > { %v802_v29 = vadd.f32 %v801_v25, %v639_v24  ;;  %v563_v31 = vadd.f32 %v2069_v10, %v562_v27  ;;  %v855_v24 = vld [vmem:[%s2325_s3 + $0xd0] sm:$0xff]  ;;  %v864_v25 = vld [vmem:[%s2325_s3 + $0x118] sm:$0xff] }
 0x111   : > { %v642_v36 = vmax.f32 %v568_v30, 0.0  ;;  %v1591_v27 = vpack.c.bf16 %v855_v24, %v847_v23  ;;  %v871_v30 = vld [vmem:[%s2325_s3 + $0x150] sm:$0xff]  ;;  %v900_v23 = vld [vmem:[%s2325_s3 + $0x238] sm:$0xff] }
 0x112   : > { %v641_v32 = vmax.f32 %v563_v31, 0.0  ;;  %v803_v33 = vadd.f32 %v802_v29, %v640_v28  ;;  %v1532_v34 = vpop.f32.mrb[22].mxu0  ;;  %v1593_v28 = vpack.c.bf16 %v872_v26, %v864_v25  ;;  %v863_v29 = vld [vmem:[%s2325_s3 + $0x110] sm:$0xff]  ;;  %v880_v31 = vld [vmem:[%s2325_s3 + $0x198] sm:$0xff] }
 0x113   : > { %v572_v35 = vpop.f32.mrb[23].mxu0  ;;  %v578_v38 = vadd.f32 %v1532_v34, %v2069_v10  ;;  %v908_v24 = vld [vmem:[%s2325_s3 + $0x278] sm:$0xff] }
 0x114   : > { %v804_v37 = vadd.f32 %v803_v33, %v641_v32  ;;  %v573_v39 = vadd.f32 %v2069_v10, %v572_v35  ;;  %v888_v32 = vld [vmem:[%s2325_s3 + $0x1d8] sm:$0xff]  ;;  %v1595_v33 = vpack.c.bf16 %v871_v30, %v863_v29  ;;  %v879_v35 = vld [vmem:[%s2325_s3 + $0x190] sm:$0xff]  ;;  %v1665_v26 = vpack.c.bf16 %v908_v24, %v900_v23 }
 0x115   : > { %v644_v45 = vmax.f32 %v578_v38, 0.0  ;;  %v1597_v34 = vpack.c.bf16 %v888_v32, %v880_v31  ;;  %v904_v38 = vld [vmem:[%s2325_s3 + $0x258] sm:$0xff]  ;;  %v989_v23 = vsub.s32 7, %v2097_v49 }
 0x116   : > { %v643_v41 = vmax.f32 %v573_v39, 0.0  ;;  %v805_v42 = vadd.f32 %v804_v37, %v642_v36  ;;  %v1535_v43 = vpop.f32.mrb[24].mxu0  ;;  %v887_v36 = vld [vmem:[%s2325_s3 + $0x1d0] sm:$0xff]  ;;  %v896_v37 = vld [vmem:[%s2325_s3 + $0x218] sm:$0xff] }
 0x117   : > { %v582_v44 = vpop.f32.mrb[25].mxu0  ;;  %v588_v47 = vadd.f32 %v1535_v43, %v2069_v10  ;;  %v1599_v39 = vpack.c.bf16 %v887_v36, %v879_v35  ;;  %v1601_v40 = vpack.c.bf16 %v904_v38, %v896_v37  ;;  %v912_v43 = vld [vmem:[%s2325_s3 + $0x298] sm:$0xff] }
 0x118   : > { %v806_v46 = vadd.f32 %v805_v42, %v643_v41  ;;  %v583_v48 = vadd.f32 %v2069_v10, %v582_v44  ;;  %v895_v41 = vld [vmem:[%s2325_s3 + $0x210] sm:$0xff]  ;;  %v920_v44 = vld [vmem:[%s2325_s3 + $0x2d8] sm:$0xff] }
 0x119   : > { %v646_v54 = vmax.f32 %v588_v47, 0.0  ;;  %v903_v42 = vld [vmem:[%s2325_s3 + $0x250] sm:$0xff]  ;;  %v916_v29 = vld [vmem:[%s2325_s3 + $0x2b8] sm:$0xff] }
 0x11a   : > { %v645_v50 = vmax.f32 %v583_v48, 0.0  ;;  %v807_v51 = vadd.f32 %v806_v46, %v644_v45  ;;  %v1538_v52 = vpop.f32.mrb[26].mxu0  ;;  %v1603_v45 = vpack.c.bf16 %v903_v42, %v895_v41  ;;  %v1605_v46 = vpack.c.bf16 %v920_v44, %v912_v43  ;;  %v911_v47 = vld [vmem:[%s2325_s3 + $0x290] sm:$0xff]  ;;  %v924_v30 = vld [vmem:[%s2325_s3 + $0x2f8] sm:$0xff] }
 0x11b   : > { %v592_v53 = vpop.f32.mrb[27].mxu0  ;;  %v598_v56 = vadd.f32 %v1538_v52, %v2069_v10  ;;  %v919_v48 = vld [vmem:[%s2325_s3 + $0x2d0] sm:$0xff]  ;;  %v1669_v32 = vpack.c.bf16 %v924_v30, %v916_v29  ;;  %v932_v35 = vld [vmem:[%s2325_s3 + $0x338] sm:$0xff] }
 0x11c   : > { %v808_v55 = vadd.f32 %v807_v51, %v645_v50  ;;  %v593_v57 = vadd.f32 %v2069_v10, %v592_v53  ;;  %v928_v50 = vld [vmem:[%s2325_s3 + $0x318] sm:$0xff]  ;;  %v1607_v52 = vpack.c.bf16 %v919_v48, %v911_v47 }
 0x11d   : > { %v648_v63 = vmax.f32 %v598_v56, 0.0  ;;  %v936_v51 = vld [vmem:[%s2325_s3 + $0x358] sm:$0xff] }
 0x11e   : > { %v647_v59 = vmax.f32 %v593_v57, 0.0  ;;  %v809_v60 = vadd.f32 %v808_v55, %v646_v54  ;;  %v1541_v61 = vpop.f32.mrb[28].mxu0  ;;  %v1609_v53 = vpack.c.bf16 %v936_v51, %v928_v50  ;;  %v927_v54 = vld [vmem:[%s2325_s3 + $0x310] sm:$0xff]  ;;  %v944_v56 = vld [vmem:[%s2325_s3 + $0x398] sm:$0xff]  ;;  %v961_v51 = vsub.s32 0, %v2097_v49 }
 0x11f   : > { %v602_v62 = vpop.f32.mrb[29].mxu0  ;;  %v935_v55 = vld [vmem:[%s2325_s3 + $0x350] sm:$0xff]  ;;  %v952_v57 = vld [vmem:[%s2325_s3 + $0x3d8] sm:$0xff] }
 0x120   : > { %v810_v0 = vadd.f32 %v809_v60, %v647_v59  ;;  %v603_v1 = vadd.f32 %v2069_v10, %v602_v62  ;;  %v839_v10 = vld [vmem:[%s2325_s3 + $0x50] sm:$0xff]  ;;  %v1611_v58 = vpack.c.bf16 %v935_v55, %v927_v54  ;;  %v1613_v59 = vpack.c.bf16 %v952_v57, %v944_v56  ;;  %v836_v62 = vld [vmem:[%s2325_s3 + $0x38] sm:$0xff] }
 0x121   : > { %v1587_v19 = vpack.c.bf16 %v839_v10, %v831_v15  ;;  %v943_v60 = vld [vmem:[%s2325_s3 + $0x390] sm:$0xff]  ;;  %v940_v36 = vld [vmem:[%s2325_s3 + $0x378] sm:$0xff]  ;;  %v965_v54 = vsub.s32 1, %v2097_v49  ;;  %v981_v55 = vsub.s32 5, %v2097_v49 }
 0x122   : > { %v811_v2 = vadd.f32 %v810_v0, %v648_v63  ;;  %v649_v3 = vmax.f32 %v603_v1, 0.0  ;;  %v951_v61 = vld [vmem:[%s2325_s3 + $0x3d0] sm:$0xff]  ;;  %v844_v63 = vld [vmem:[%s2325_s3 + $0x78] sm:$0xff]  ;;  %v1673_v38 = vpack.c.bf16 %v940_v36, %v932_v35  ;;  %v1544_v48 = vpop.f32.mrb[30].mxu0 }
 0x123   : > { %v1615_v0 = vpack.c.bf16 %v951_v61, %v943_v60  ;;  %v1649_v1 = vpack.c.bf16 %v844_v63, %v836_v62  ;;  %v867_v15 = vld [vmem:[%s2325_s3 + $0x130] sm:$0xff]  ;;  %v948_v41 = vld [vmem:[%s2325_s3 + $0x3b8] sm:$0xff]  ;;  %v612_v50 = vpop.f32.mrb[31].mxu0 }
 0x124   : > { %v780_v4 = vsel %vm748_vm1, %v649_v3, 0.0  ;;  %v843_v3 = vld [vmem:[%s2325_s3 + $0x70] sm:$0xff]  ;;  %v956_v42 = vld [vmem:[%s2325_s3 + $0x3f8] sm:$0xff] }
 0x125   : > { %v812_v5 = vadd.f32 %v811_v2, %v780_v4  ;;  %v835_v2 = vld [vmem:[%s2325_s3 + $0x30] sm:$0xff]  ;;  %v852_v4 = vld [vmem:[%s2325_s3 + $0xb8] sm:$0xff]  ;;  %v1677_v44 = vpack.c.bf16 %v956_v42, %v948_v41 }
 0x126   : > { %v875_v10 = vld [vmem:[%s2325_s3 + $0x170] sm:$0xff] }
 0x127   : > { %v816_v6 = vrot.slane %v812_v5, 4 }
 0x129   : > { %v817_v7 = vadd.f32 %v816_v6, %v812_v5  ;;  %v860_v5 = vld [vmem:[%s2325_s3 + $0xf8] sm:$0xff]  ;;  %v1651_v6 = vpack.c.bf16 %v843_v3, %v835_v2 }
 0x12b   : > { %v818_v8 = vrot.slane %v817_v7, 2 }
 0x12d   : > { %v819_v9 = vadd.f32 %v818_v8, %v817_v7  ;;  %v1653_v7 = vpack.c.bf16 %v860_v5, %v852_v4  ;;  %v851_v8 = vld [vmem:[%s2325_s3 + $0xb0] sm:$0xff]  ;;  %v969_v5 = vsub.s32 2, %v2097_v49 }
 0x12f   : > { %v820_v11 = vrot.slane %v819_v9, 1 }
 0x131   : > { %v821_v13 = vadd.f32 %v820_v11, %v819_v9  ;;  %v859_v9 = vld [vmem:[%s2325_s3 + $0xf0] sm:$0xff]  ;;  %v868_v11 = vld [vmem:[%s2325_s3 + $0x138] sm:$0xff] }
 0x133   : > { %v822_v14 = vadd.f32 %v821_v13, %v784_v12  ;;  %v876_v12 = vld [vmem:[%s2325_s3 + $0x178] sm:$0xff]  ;;  %v1655_v13 = vpack.c.bf16 %v859_v9, %v851_v8  ;;  %v973_v8 = vsub.s32 3, %v2097_v49 }
 0x135   : > { %823 = vst [vmem:[#allocation2] sm:$0x1] %v822_v14  ;;  %v1657_v14 = vpack.c.bf16 %v876_v12, %v868_v11 }
 0x13c   : > { %v827_v18 = vld [vmem:[#allocation2] sm:$0x1] }
 0x13d   : > { %v2115_v20 = vmul.f32 0.0044444446, %v827_v18  ;;  %v1661_v18 = vpack.c.bf16 %v892_v17, %v884_v16 }
 0x13f   : > { %1064 = vmatmul.mubr.f32.vlgmr.msra.gmra.mrb[0].mxu1 %v2115_v20  ;;  %1206 = vmatmul.mubr.f32.vlgmr.msra.gmra.mrb[32].mxu0 %v2115_v20 }
 0x140   : > { %1588 = vmatpush1.bf16.msra.mxu1 %v1587_v19  ;;  %1134 = vmatprep.mubr.f32.mxu1 %v1731_v22  ;;  %v883_v19 = vld [vmem:[%s2325_s3 + $0x1b0] sm:$0xff] }
 0x141   : > { %1590 = vmatprep.subr.bf16.mxu1 %v1589_v21  ;;  %v891_v21 = vld [vmem:[%s2325_s3 + $0x1f0] sm:$0xff] }
 0x142   : > { %v1663_v25 = vpack.c.bf16 %v891_v21, %v883_v19  ;;  %v985_v21 = vsub.s32 6, %v2097_v49 }
 0x144   : > { %1592 = vmatpush1.bf16.msra.mxu1 %v1591_v27  ;;  %v899_v27 = vld [vmem:[%s2325_s3 + $0x230] sm:$0xff] }
 0x145   : > { %1594 = vmatprep.subr.bf16.mxu1 %v1593_v28  ;;  %v907_v28 = vld [vmem:[%s2325_s3 + $0x270] sm:$0xff] }
 0x146   : > { %v1667_v31 = vpack.c.bf16 %v907_v28, %v899_v27 }
 0x148   : > { %1596 = vmatpush1.bf16.msra.mxu1 %v1595_v33  ;;  %v915_v33 = vld [vmem:[%s2325_s3 + $0x2b0] sm:$0xff] }
 0x149   : > { %1598 = vmatprep.subr.bf16.mxu1 %v1597_v34  ;;  %v923_v34 = vld [vmem:[%s2325_s3 + $0x2f0] sm:$0xff] }
 0x14a   : > { %v1671_v37 = vpack.c.bf16 %v923_v34, %v915_v33 }
 0x14c   : > { %1600 = vmatpush1.bf16.msra.mxu1 %v1599_v39  ;;  %v931_v39 = vld [vmem:[%s2325_s3 + $0x330] sm:$0xff] }
 0x14d   : > { %1602 = vmatprep.subr.bf16.mxu1 %v1601_v40  ;;  %v939_v40 = vld [vmem:[%s2325_s3 + $0x370] sm:$0xff] }
 0x14e   : > { %v1675_v43 = vpack.c.bf16 %v939_v40, %v931_v39 }
 0x150   : > { %1604 = vmatpush1.bf16.msra.mxu1 %v1603_v45  ;;  %v947_v45 = vld [vmem:[%s2325_s3 + $0x3b0] sm:$0xff] }
 0x151   : > { %1606 = vmatprep.subr.bf16.mxu1 %v1605_v46  ;;  %v955_v46 = vld [vmem:[%s2325_s3 + $0x3f0] sm:$0xff] }
 0x152   : > { %v1679_v47 = vpack.c.bf16 %v955_v46, %v947_v45 }
 0x154   : > { %1608 = vmatpush1.bf16.msra.mxu1 %v1607_v52  ;;  %v977_v52 = vsub.s32 4, %v2097_v49 }
 0x155   : > { %1610 = vmatprep.subr.bf16.mxu1 %v1609_v53  ;;  %v957_v53 = vld [vmem:[%s2326_s4] sm:$0xff] }
 0x156   : > { %v962_v56 = vrot.slane %v957_v53, %v961_v51  ;;  %v978_v57 = vrot.slane %v957_v53, %v977_v52  ;;  %v970_v9 = vrot.slane %v957_v53, %v969_v5  ;;  %v974_v12 = vrot.slane %v957_v53, %v973_v8 }
 0x157   : > { %v986_v24 = vrot.slane %v957_v53, %v985_v21 }
 0x158   : > { %1612 = vmatpush1.bf16.msra.mxu1 %v1611_v58  ;;  %v966_v58 = vrot.slane %v957_v53, %v965_v54 }
 0x159   : > { %1614 = vmatprep.subr.bf16.mxu1 %v1613_v59  ;;  %v982_v59 = vrot.slane %v957_v53, %v981_v55 }
 0x15c   : > { %1616 = vmatpush1.bf16.msra.mxu1 %v1615_v0 }
 0x15d   : > { %1650 = vmatprep.subr.bf16.mxu1 %v1649_v1 }
 0x15f   : > { %1135 = vmatmul.mubr.f32.vlgmr.msra.gmra.mrb[2].mxu1 %v2115_v20 }
 0x160   : > { %1652 = vmatpush1.bf16.msra.mxu1 %v1651_v6  ;;  %1276 = vmatprep.mubr.f32.mxu1 %v1731_v22  ;;  %v1659_v22 = vpack.c.bf16 %v875_v10, %v867_v15  ;;  %v1732_v6 = vmov 1966171168  }
 0x161   : > { %1654 = vmatprep.subr.bf16.mxu1 %v1653_v7  ;;  %v1296_v7 = vunpack.c.l.s4 %v1732_v6 }
 0x163   : > { %v1297_v11 = vunpack.c.0.s8 %v1296_v7 }
 0x164   : > { %1656 = vmatpush1.bf16.msra.mxu1 %v1655_v13 }
 0x165   : > { %1658 = vmatprep.subr.bf16.mxu1 %v1657_v14  ;;  %v1300_v10 = vsub.s32 %v1297_v11, %v2097_v49 }
 0x168   : > { %1660 = vmatpush1.bf16.msra.mxu1 %v1659_v22 }
 0x169   : > { %1662 = vmatprep.subr.bf16.mxu1 %v1661_v18 }
 0x16c   : > { %1664 = vmatpush1.bf16.msra.mxu1 %v1663_v25  ;;  %v990_v25 = vrot.slane %v957_v53, %v989_v23 }
 0x16d   : > { %1666 = vmatprep.subr.bf16.mxu1 %v1665_v26 }
 0x170   : > { %1668 = vmatpush1.bf16.msra.mxu1 %v1667_v31 }
 0x171   : > { %1670 = vmatprep.subr.bf16.mxu1 %v1669_v32 }
 0x174   : > { %1672 = vmatpush1.bf16.msra.mxu1 %v1671_v37 }
 0x175   : > { %1674 = vmatprep.subr.bf16.mxu1 %v1673_v38 }
 0x178   : > { %1676 = vmatpush1.bf16.msra.mxu1 %v1675_v43 }
 0x179   : > { %1678 = vmatprep.subr.bf16.mxu1 %v1677_v44 }
 0x17c   : > { %1680 = vmatpush1.bf16.msra.mxu1 %v1679_v47 }
 0x17f   : > { %1277 = vmatmul.mubr.f32.vlgmr.msra.gmra.mrb[4].mxu1 %v2115_v20 }
 0x212   : > { %v1065_v60 = vpop.f32.mrb[0].mxu1  ;;  %v1207_v20 = vpop.f32.mrb[32].mxu0 }
 0x213   : > { %v1066_v61 = vadd.f32 %v1065_v60, %v962_v56  ;;  %v1208_v62 = vadd.f32 %v1207_v20, %v978_v57  ;;  %v1067_v63 = vpop.f32.mrb[1].mxu1  ;;  %v1209_v0 = vpop.f32.mrb[33].mxu0 }
 0x214   : > { %v1068_v1 = vadd.f32 %v1067_v63, %v966_v58  ;;  %v1210_v2 = vadd.f32 %v1209_v0, %v982_v59 }
 0x216   : > { %v1291_v3 = vcombine.low %v1066_v61, %v1068_v1  ;;  %v1293_v4 = vcombine.low %v1208_v62, %v1210_v2 }
 0x218   : > { %v1301_v22 = vrot.slane %v1291_v3, %v1300_v10  ;;  %v1315_v31 = vrot.slane %v1293_v4, %v1300_v10 }
 0x232   : > { %v1136_v13 = vpop.f32.mrb[2].mxu1 }
 0x233   : > { %v1137_v14 = vadd.f32 %v1136_v13, %v970_v9  ;;  %v1138_v15 = vpop.f32.mrb[3].mxu1 }
 0x234   : > { %v1139_v16 = vadd.f32 %v1138_v15, %v974_v12 }
 0x236   : > { %v1292_v17 = vcombine.low %v1137_v14, %v1139_v16 }
 0x238   : > { %v1308_v18 = vrot.slane %v1292_v17, %v1300_v10 }
 0x23a   : > { %v1323_v19 = vcombine.low %v1301_v22, %v1308_v18 }
 0x23c   : > { %v1331_v34 = vrot.slane %v1323_v19, %v1300_v10 }
 0x252   : > { %v1278_v26 = vpop.f32.mrb[4].mxu1 }
 0x253   : > { %v1279_v27 = vadd.f32 %v1278_v26, %v986_v24  ;;  %v1280_v28 = vpop.f32.mrb[5].mxu1 }
 0x254   : > { %v1281_v29 = vadd.f32 %v1280_v28, %v990_v25 }
 0x256   : > { %v1294_v30 = vcombine.low %v1279_v27, %v1281_v29 }
 0x258   : > { %v1322_v32 = vrot.slane %v1294_v30, %v1300_v10 }
 0x25a   : > { %v1324_v33 = vcombine.low %v1315_v31, %v1322_v32 }
 0x25c   : > { %v1338_v35 = vrot.slane %v1324_v33, %v1300_v10 }
 0x25e   : > { %v1339_v36 = vcombine.low %v1331_v34, %v1338_v35 }
 0x260   : > { %1341 = vst [vmem:[%s250_s29] sm:$0xff] %v1339_v36 }
 0x261 PF: > { %s15_s20 = sadd.s32 1, %s1729_s20   ;;  %s2328_s18 = smov %s1725_s19 }
 0x262   : > { %p12_p5 = scmp.ge.s32.totalorder %s15_s20, 4   ;;  %s2329_s19 = smov %s2331_s21 }
 0x264   :  { %14 = sbr.rel (!%p12_p5) target bundleno = 2 (0x2), region = 78 }

</bundles_post_ra>
